<compile_context>
chip_gen: v7x
topology: tpu7x:2x2x1
jax: 0.10.0
libtpu: 0.0.40
codegen_flags: <defaults>
</compile_context>

<pallas_src>
import jax
import jax.numpy as jnp
from jax import lax
from jax.experimental import pallas as pl
from jax.experimental.pallas import tpu as pltpu


def _round_up(x, m):
    return ((x + m - 1) // m) * m


def _vmem_budget_bytes():
    """Generation-aware VMEM cap (physical minus ~16 MiB headroom), safe fallback."""
    cap = 64 << 20
    try:
        cap = int(getattr(pltpu.get_tpu_info(), "vmem_capacity_bytes", cap))
    except Exception:
        pass
    return max(32 << 20, cap - (16 << 20))


def prepare_params(W, bias, charge_table, index_table, *, compute_dtype=jnp.bfloat16):
    """One-time parameter prep (call at init, not per forward).

    * W is the PyTorch Linear weight [out, in]; store W^T [in, out] in bf16.
    * bias + charge_embedding + additional_peak_embedding are folded into a single
      32-row combined table indexed by cid = charge*3 + index (rows 30,31 are zero
      pad); kept in f32 so the additive path stays exact.
    """
    H = W.shape[0]
    wt = jnp.asarray(W).T.astype(compute_dtype)                           # [H, H]
    comb = (charge_table[:, None, :] + index_table[None, :, :]
            + bias[None, None, :]).reshape(30, H).astype(jnp.float32)
    comb = jnp.pad(comb, ((0, 2), (0, 0)))                                # [32, H]
    return wt, comb


def _spectra_embedding_kernel(src_ref,   # [TM, H]   compute dtype
                              cid_ref,   # [TM, 1]   int32   (charge*3 + index)
                              wt_ref,    # [H, TN]   compute dtype (W^T column block)
                              tab_ref,   # [32, TN]  f32     (bias+charge+index table)
                              out_ref):  # [TM, TN]  f32
    # Linear: src @ W^T on the MXU, f32 accumulation.
    x = jnp.dot(src_ref[...], wt_ref[...], preferred_element_type=jnp.float32)

    # bias + charge + index embeddings via one tiny one-hot matmul (K = 32).
    cid = cid_ref[...]                                                    # [TM, 1]
    oh = (cid == lax.broadcasted_iota(jnp.int32, (cid.shape[0], 32), 1))
    add = jnp.dot(oh.astype(jnp.float32), tab_ref[...],
                  preferred_element_type=jnp.float32)                     # [TM, TN]

    out_ref[...] = (x + add).astype(out_ref.dtype)


def spectra_embedding(src, charge, index, wt, comb_table, *,
                      row_tile=512, col_tile=512):
    """out = Linear(src) + charge_emb(charge)[:, None, :] + index_emb(index)."""
    B, S, H = src.shape
    M = B * S
    compute_dtype = wt.dtype
    in_bytes = wt.dtype.itemsize

    # ---- layout prep: pure reshapes + a tiny int stream (no pad / slice passes) ----
    src2 = src.reshape(M, H).astype(compute_dtype)    # cast fuses with producer under jit
    cid = (charge.astype(jnp.int32)[:, None] * 3
           + index.astype(jnp.int32)).reshape(M, 1)

    # ---- tiling ----
    # Columns: full H unless H is a large multiple of 128 (bounds W^T's VMEM block).
    TN = col_tile if (H % 128 == 0 and H > col_tile) else H

    budget = _vmem_budget_bytes()

    def blocks_bytes(tm):
        # worst case: every operand double-buffered by the pipeline
        return 2 * (tm * H * in_bytes       # src block
                    + tm * 128 * 4          # cid block (lane-padded)
                    + H * TN * in_bytes     # W^T block
                    + 32 * TN * 4           # combined table block
                    + tm * TN * 4)          # out block

    # Rows: as large as VMEM allows, multiple of 8 (or the full M when M is small).
    TM = _round_up(min(row_tile, M), 8)
    while TM > 64 and blocks_bytes(TM) > budget - (8 << 20):
        TM = _round_up(TM // 2, 8)
    if TM > M:
        TM = M                              # full-dim row block (always legal)

    n_m = pl.cdiv(M, TM)
    n_n = pl.cdiv(H, TN)

    cost = pl.CostEstimate(
        flops=2 * M * H * H + 2 * M * 32 * H,
        transcendentals=0,
        bytes_accessed=(M * H * in_bytes        # src
                        + H * H * in_bytes      # W^T
                        + M * 4                 # cid
                        + 32 * H * 4            # table
                        + M * H * 4))           # out

    out = pl.pallas_call(
        _spectra_embedding_kernel,
        out_shape=jax.ShapeDtypeStruct((M, H), jnp.float32),
        grid=(n_m, n_n),
        in_specs=[
            pl.BlockSpec((TM, H), lambda m, n: (m, 0)),     # src rows
            pl.BlockSpec((TM, 1), lambda m, n: (m, 0)),     # cid rows
            pl.BlockSpec((H, TN), lambda m, n: (0, n)),     # W^T column block
            pl.BlockSpec((32, TN), lambda m, n: (0, n)),    # combined table block
        ],
        out_specs=pl.BlockSpec((TM, TN), lambda m, n: (m, n)),
        compiler_params=pltpu.CompilerParams(
            dimension_semantics=("parallel", "parallel"),
            vmem_limit_bytes=int(budget)),
        cost_estimate=cost,
    )(src2, cid, wt, comb_table)

    return out.reshape(B, S, H)


def reference(src, charge, index, W, bias, charge_table, index_table):
    lin = jnp.einsum("bsh,oh->bso", src, W) + bias
    return lin + charge_table[charge][:, None, :] + index_table[index]


if __name__ == "__main__":
    B, S, H = 2, 8, 32

    key = jax.random.PRNGKey(0)
    k_src, k_w, k_b, k_ce, k_ie, k_ch, k_ix = jax.random.split(key, 7)

    # deterministic synthetic parameters (shapes from the module __init__)
    W = jax.random.normal(k_w, (H, H), jnp.float32) * 0.1           # Linear weight [out, in]
    bias = jax.random.normal(k_b, (H,), jnp.float32) * 0.1          # Linear bias
    charge_table = jax.random.normal(k_ce, (10, H), jnp.float32)    # nn.Embedding(10, H)
    index_table = jax.random.normal(k_ie, (3, H), jnp.float32)      # nn.Embedding(3, H)

    # inputs
    src = jax.random.normal(k_src, (B, S, H), jnp.float32)
    charge = jax.random.randint(k_ch, (B,), 0, 10, jnp.int32)
    index = jax.random.randint(k_ix, (B, S), 0, 3, jnp.int32)

    wt, comb = prepare_params(W, bias, charge_table, index_table)   # one-time init work
    out = spectra_embedding(src, charge, index, wt, comb)
    out = jax.block_until_ready(out)

    ref = reference(src, charge, index, W, bias, charge_table, index_table)
    assert out.shape == (B, S, H), out.shape
    # bf16 streamed operands (f32 accumulation) -> loosened tolerance vs exact f32.
    err = float(jnp.max(jnp.abs(out - ref)))
    assert jnp.allclose(out, ref, atol=1e-2, rtol=1e-2), f"max abs err = {err}"

    print("KERNEL_OK")
</pallas_src>

<mosaic_0001>
module attributes {stable_mosaic.version = 11 : i64} {
  func.func @_spectra_embedding_kernel(%arg0: i32, %arg1: i32, %arg2: memref<16x32xbf16, #tpu.memory_space<vmem>>, %arg3: memref<16x1xi32, #tpu.memory_space<vmem>>, %arg4: memref<32x32xbf16, #tpu.memory_space<vmem>>, %arg5: memref<32x32xf32, #tpu.memory_space<vmem>>, %arg6: memref<16x32xf32, #tpu.memory_space<vmem>>) attributes {dimension_semantics = [#tpu.dimension_semantics<parallel>, #tpu.dimension_semantics<parallel>], iteration_bounds = array<i64: 1, 1>, scalar_prefetch = 0 : i64, scratch_operands = 0 : i64, tpu.core_type = #tpu.core_type<tc>, window_params = [{transform_indices = @transform_0, window_bounds = array<i64: 16, 32>}, {transform_indices = @transform_1, window_bounds = array<i64: 16, 1>}, {transform_indices = @transform_2, window_bounds = array<i64: 32, 32>}, {transform_indices = @transform_3, window_bounds = array<i64: 32, 32>}, {transform_indices = @transform_4, window_bounds = array<i64: 16, 32>}]} {
    %c0 = arith.constant 0 : index
    %c0_0 = arith.constant 0 : index
    %0 = vector.load %arg2[%c0, %c0_0] : memref<16x32xbf16, #tpu.memory_space<vmem>>, vector<16x32xbf16>
    %c0_1 = arith.constant 0 : index
    %c0_2 = arith.constant 0 : index
    %1 = vector.load %arg4[%c0_1, %c0_2] : memref<32x32xbf16, #tpu.memory_space<vmem>>, vector<32x32xbf16>
    %cst = arith.constant dense<0.000000e+00> : vector<16x32xf32>
    %2 = tpu.matmul %0, %1, %cst {dimension_numbers = #tpu.dot_dimension_numbers<[1], [0], [0], [1], [0, 0, 1, 1], [], []>} : vector<16x32xbf16>, vector<32x32xbf16>, vector<16x32xf32> -> vector<16x32xf32>
    %c0_3 = arith.constant 0 : index
    %c0_4 = arith.constant 0 : index
    %3 = vector.load %arg3[%c0_3, %c0_4] : memref<16x1xi32, #tpu.memory_space<vmem>>, vector<16x1xi32>
    %4 = tpu.iota {dimensions = array<i32: 1>} : vector<16x32xi32>
    %5 = vector.broadcast %3 : vector<16x1xi32> to vector<16x32xi32>
    %6 = arith.cmpi eq, %5, %4 : vector<16x32xi32>
    %7 = arith.extui %6 : vector<16x32xi1> to vector<16x32xi32>
    %8 = arith.sitofp %7 : vector<16x32xi32> to vector<16x32xf32>
    %c0_5 = arith.constant 0 : index
    %c0_6 = arith.constant 0 : index
    %9 = vector.load %arg5[%c0_5, %c0_6] : memref<32x32xf32, #tpu.memory_space<vmem>>, vector<32x32xf32>
    %cst_7 = arith.constant dense<0.000000e+00> : vector<16x32xf32>
    %10 = tpu.matmul %8, %9, %cst_7 {dimension_numbers = #tpu.dot_dimension_numbers<[1], [0], [0], [1], [0, 0, 1, 1], [], []>} : vector<16x32xf32>, vector<32x32xf32>, vector<16x32xf32> -> vector<16x32xf32>
    %11 = arith.addf %2, %10 : vector<16x32xf32>
    %c0_8 = arith.constant 0 : index
    %c0_9 = arith.constant 0 : index
    %12 = vector.load %arg6[%c0_8, %c0_9] : memref<16x32xf32, #tpu.memory_space<vmem>>, vector<16x32xf32>
    tpu.vector_store %arg6[%c0_8, %c0_9], %11 {strides = array<i32>} : memref<16x32xf32, #tpu.memory_space<vmem>>, vector<16x32xf32>,
    return
  }
  func.func @transform_0(%arg0: i32, %arg1: i32) -> (i32, i32) {
    %c0_i32 = arith.constant 0 : i32
    %c0_i32_0 = arith.constant 0 : i32
    return %arg0, %c0_i32 : i32, i32
  }
  func.func @transform_1(%arg0: i32, %arg1: i32) -> (i32, i32) {
    %c0_i32 = arith.constant 0 : i32
    %c0_i32_0 = arith.constant 0 : i32
    return %arg0, %c0_i32 : i32, i32
  }
  func.func @transform_2(%arg0: i32, %arg1: i32) -> (i32, i32) {
    %c0_i32 = arith.constant 0 : i32
    %c0_i32_0 = arith.constant 0 : i32
    return %c0_i32, %arg1 : i32, i32
  }
  func.func @transform_3(%arg0: i32, %arg1: i32) -> (i32, i32) {
    %c0_i32 = arith.constant 0 : i32
    %c0_i32_0 = arith.constant 0 : i32
    return %c0_i32, %arg1 : i32, i32
  }
  func.func @transform_4(%arg0: i32, %arg1: i32) -> (i32, i32) {
    %c0_i32 = arith.constant 0 : i32
    return %arg0, %arg1 : i32, i32
  }
}

</mosaic_0001>

<bundles_post_ra>
// kernel: tpu_custom_call.1
= control target key start
LH: loop header
LB: loop body
LE: loop exit
PB: predicated region body
PF: predicated region fallthrough
CT: control target
= control target key end

     0   :  { %9 = vsyncpa [#allocation3], 0  ;;  %s406_s0 = inlined_call_operand.vmem [shape: bf16[16,32], index: 0, kind: input, shape index: {}]   ;;  %s407_s1 = inlined_call_operand.vmem [shape: s32[16,1], index: 1, kind: input, shape index: {}]   ;;  %s408_s2 = inlined_call_operand.vmem [shape: bf16[32,32], index: 2, kind: input, shape index: {}]   ;;  %s409_s3 = inlined_call_operand.hbm [shape: f32[32,32], index: 3, kind: input, shape index: {}]   ;;  %s410_s4 = inlined_call_operand.hbm [shape: f32[16,32], index: 4, kind: output, shape index: {}]  }
   0x1   :  { %10 = vsyncpa [#allocation4], 0  ;;  %s324_s15 = smov [#allocation2]   ;;  %s276_s19 = scalar_lea.hbm %s409_s3, 512 }
   0x2   :  { %s22_s16 = sshll.u32 %s324_s15, 4  ;;  %p277_p0 = scmp.ne.s32.totalorder %s409_s3, %s276_s19  ;;  %s23_s16 = int_to_ptr.vmem [resolvable:$true] %s22_s16 }
   0x3   :  { %p280_p1 = scmp.lt.u32.totalorder %s276_s19, %s409_s3 }
   0x5   :  { %p282_p2 = pnand %p280_p1, %p277_p0 }
   0x7   :  { %285 = shalt.err (!%p282_p2)
}
   0x8   :  { %s286_s24 = scalar_lea.vmem %s23_s16, 512  ;;  %p291_p4 = scmp.lt.s32.totalorder %s23_s16, %s23_s16 }
   0x9   :  { %p287_p3 = scmp.ne.s32.totalorder %s23_s16, %s286_s24  ;;  %p292_p5 = scmp.lt.s32.totalorder %s286_s24, %s286_s24 }
   0xb   :  { %p293_p6 = por %p292_p5, %p291_p4 }
   0xd   :  { %p294_p7 = pnand %p293_p6, %p287_p3 }
   0xf   :  { %297 = shalt.err (!%p294_p7)
}
  0x10   :  { %s325_s25 = smov 128   ;;  %s326_s26 = smov 8  }
  0x11   :  { %28 = dma.hbm_to_vmem [thread:$0]  %s409_s3, 512, %s23_s16, [#allocation3], %s325_s25, %s325_s25, %s326_s26  }
  0x12   :  { %320 = dma.done.wait [#allocation3], 512  }
  0x13   :  { %321 = vsyncadd [#allocation3], 4294966784  ;;  %v327_v0 = vmov 0   ;;  %v328_v1 = vmov 0.0   ;;  %v39_v2 = vld [vmem:[%s407_s1] sm:$0xff]  ;;  %v40_v3 = vld [vmem:[%s407_s1 + $0x8] sm:$0xff]  ;;  %v41_v13 = vlaneseq }
  0x14   :  { %272 = vset.pattern.permute.xlu0 %v327_v0  ;;  %249 = vmatprep.subr.bf16.mxu1 %v328_v1  ;;  %v273_v4 = vld [vmem:[%s408_s2] sm:$0xff]   ;;  %v56_v6 = vld [vmem:[#allocation2 + $0x8] sm:$0xff]  ;;  %vm329_vm0 = vmmov 0   ;;  %v57_v9 = vld [vmem:[#allocation2 + $0x10] sm:$0xff]  ;;  %vm59_vm1 = vcmask 261120  }
  0x15   :  { %44 = vperm.xlu0 %272, %v39_v2   ;;  %v55_v5 = vld [vmem:[#allocation2] sm:$0xff]  ;;  %253 = vmatprep.mubr.msk.bf16.mxu1 %vm329_vm0, %v328_v1  ;;  %v274_v8 = vld [vmem:[%s408_s2 + $0x8] sm:$0xff]   ;;  %v58_v10 = vld [vmem:[#allocation2 + $0x18] sm:$0xff]  ;;  %v42_v14 = vand.u32 127, %v41_v13 }
  0x16   :  { %250 = vmatpush3.bf16.msra.mxu1 %v273_v4  ;;  %v257_v7 = vpack.c.bf16 %v56_v6, %v55_v5  ;;  %v261_v11 = vpack.c.bf16 %v58_v10, %v57_v9  ;;  %v275_v12 = vld [vmem:[%s406_s0] sm:$0xff]   ;;  %s330_s0 = smov [#allocation5]  }
  0x17   :  { %251 = vmatprep.subr.bf16.mxu1 %v328_v1  ;;  %s209_s2 = sshll.u32 %s330_s0, 4  ;;  %s210_s2 = int_to_ptr.vmem [resolvable:$true] %s209_s2 }
  0x18   :  { %258 = vmatprep.subr.bf16.mxu0 %v257_v7  ;;  %s298_s11 = scalar_lea.vmem %s210_s2, 256  ;;  %p303_p9 = scmp.lt.s32.totalorder %s210_s2, %s210_s2 }
  0x19   :  { %47 = vperm.xlu0 %272, %v40_v3   ;;  %260 = vmatpush3.bf16.msra.mxu0 %v257_v7  ;;  %p299_p8 = scmp.ne.s32.totalorder %s210_s2, %s298_s11  ;;  %p304_p10 = scmp.lt.s32.totalorder %s298_s11, %s298_s11 }
  0x1a   :  { %252 = vmatpush3.bf16.msra.mxu1 %v274_v8  ;;  %262 = vmatprep.subr.bf16.mxu0 %v261_v11 }
  0x1b   :  { %p305_p11 = por %p304_p10, %p303_p9 }
  0x1d   :  { %254 = vmatmul.mubr.msk.bf16.vlgmr.msra.gmra.mrb[0].mxu1 %vm59_vm1, %v275_v12  ;;  %264 = vmatpush3.bf16.msra.mxu0 %v261_v11  ;;  %p306_p12 = pnand %p305_p11, %p299_p8 }
  0x94   :  { %v45_v15 = vpop.permute.xlu0 %44 }
  0x95   :  { %vm49_vm2 = vcmp.eq.s32.totalorder %v45_v15, %v42_v14 }
  0x96   :  { %v221_v16 = vsel %vm49_vm2, 1.0, %v328_v1 }
  0x97   :  { %246 = vmatprep.mubr.msk.f32.mxu0 %vm59_vm1, %v221_v16 }
  0x98   :  { %v48_v17 = vpop.permute.xlu0 %47 }
  0x99   :  { %vm50_vm3 = vcmp.eq.s32.totalorder %v48_v17, %v42_v14 }
  0x9a   :  { %v222_v18 = vsel %vm50_vm3, 1.0, %v328_v1 }
  0x9b   :  { %247 = vmatmul.mubr.msk.f32.vlgmr.msra.gmra.mrb[0].mxu0 %vm59_vm1, %v222_v18 }
  0xf0   :  { %v195_v19 = vpop.f32.mrb[0].mxu1 }
  0xf1   :  { %v255_v20 = vpop.f32.mrb[1].mxu1 }
  0xf2   :  { %v198_v21 = vpop.f32.mrb[2].mxu1 }
  0xf3   :  { %v256_v22 = vpop.f32.mrb[3].mxu1 }
 0x16e   :  { %v248_v23 = vpop.f32.mrb[0].mxu0 }
 0x16f   :  { %v199_v24 = vadd.f32 %v248_v23, %v198_v21  ;;  %v132_v25 = vpop.f32.mrb[1].mxu0 }
 0x170   :  { %v196_v26 = vadd.f32 %v195_v19, %v132_v25 }
 0x171   :  { %203 = vst.msk [vmem:[#allocation5 + $0x8] sm:$0xff] %vm59_vm1, %v199_v24 }
 0x172   :  { %202 = vst.msk [vmem:[#allocation5] sm:$0xff] %vm59_vm1, %v196_v26 }
 0x173   :  { %309 = shalt.err (!%p306_p12)
}
 0x174   :  { %s310_s14 = scalar_lea.hbm %s410_s4, 256 }
 0x175   :  { %p311_p13 = scmp.ne.s32.totalorder %s410_s4, %s310_s14  ;;  %p314_p0 = scmp.lt.u32.totalorder %s310_s14, %s410_s4 }
 0x177   :  { %p316_p1 = pnand %p314_p0, %p311_p13 }
 0x179   :  { %319 = shalt.err (!%p316_p1)
}
 0x17a   :  { %215 = dma.vmem_to_hbm [thread:$0]  %s210_s2, 256, %s410_s4, [#allocation4], %s325_s25, %s325_s25, %s326_s26  }
 0x17b   :  { %322 = dma.done.wait [#allocation4], 256  }
 0x17c   :  { %323 = vsyncadd [#allocation4], 4294967040 }
 0x17d   :  { %219 = vsyncpa [#allocation3], 1 }
 0x17e   :  { %220 = vsyncpa [#allocation4], 1 }

</bundles_post_ra>
